<compile_context>
chip_gen: v5e
topology: v5e:2x2
jax: 0.10.0
libtpu: 0.0.40
codegen_flags: <defaults>
</compile_context>

<pallas_src>
import functools

import jax
import jax.numpy as jnp
from jax.experimental import pallas as pl
from jax.experimental.pallas import tpu as pltpu

LANES = 128
SUBLANES = 8


def _iou_kernel(x_ref, t_ref, out_ref, inter_acc, total_acc, *,
                smooth, n_valid, tile_rows):
    i = pl.program_id(0)

    @pl.when(i == 0)
    def _():
        inter_acc[...] = jnp.zeros_like(inter_acc)
        total_acc[...] = jnp.zeros_like(total_acc)

    x = x_ref[...].astype(jnp.float32)
    t = t_ref[...].astype(jnp.float32)

    # Validity mask: covers (a) the zero tail pad of the last 128-lane row and
    # (b) unspecified data in the pipeline's boundary block when the grid
    # overhangs the array. Cheap VPU work, fully hidden under the DMA bound.
    row = jax.lax.broadcasted_iota(jnp.int32, (tile_rows, LANES), 0)
    lane = jax.lax.broadcasted_iota(jnp.int32, (tile_rows, LANES), 1)
    flat_idx = (i * tile_rows + row) * LANES + lane
    valid = flat_idx < n_valid

    s = jax.nn.sigmoid(x)
    s = jnp.where(valid, s, 0.0)
    t = jnp.where(valid, t, 0.0)

    # Fold the tile down to one vreg-shaped (8, 128) partial sum per
    # accumulator: pure vreg-to-vreg adds, no per-step cross-lane reduction.
    fold = tile_rows // SUBLANES
    inter_acc[...] += jnp.sum((s * t).reshape(fold, SUBLANES, LANES), axis=0)
    total_acc[...] += jnp.sum((s + t).reshape(fold, SUBLANES, LANES), axis=0)

    @pl.when(i == pl.num_programs(0) - 1)
    def _():
        inter = jnp.sum(inter_acc[...])
        total = jnp.sum(total_acc[...])
        union = total - inter
        loss = 1.0 - (inter + smooth) / (union + smooth)
        out_ref[...] = jnp.broadcast_to(loss, (1, LANES)).astype(jnp.float32)


def iou_loss(inputs, targets, smooth=1.0, *, tile_rows=1024):
    """Pallas TPU implementation of IoULoss.forward (returns a scalar)."""
    assert inputs.shape == targets.shape
    n = int(inputs.size)

    x = inputs.reshape(-1)
    t = targets.reshape(-1)

    # Row count aligned to the sublane (8) so blocks are (8k, 128)-tileable.
    rows = pl.cdiv(n, LANES)
    rows = pl.cdiv(rows, SUBLANES) * SUBLANES
    padded = rows * LANES
    if padded != n:
        # Only taken when numel is not a multiple of 1024; the pad values are
        # irrelevant because the kernel masks by flat index < n.
        x = jnp.pad(x, (0, padded - n))
        t = jnp.pad(t, (0, padded - n))
    x = x.reshape(rows, LANES)
    t = t.reshape(rows, LANES)

    tile_rows = max(SUBLANES, (int(tile_rows) // SUBLANES) * SUBLANES)
    tile_rows = min(tile_rows, rows)
    grid = (pl.cdiv(rows, tile_rows),)

    kernel = functools.partial(
        _iou_kernel, smooth=float(smooth), n_valid=n, tile_rows=tile_rows)

    out = pl.pallas_call(
        kernel,
        out_shape=jax.ShapeDtypeStruct((1, LANES), jnp.float32),
        grid_spec=pltpu.PrefetchScalarGridSpec(
            num_scalar_prefetch=0,
            grid=grid,
            in_specs=[
                pl.BlockSpec((tile_rows, LANES), lambda i: (i, 0)),
                pl.BlockSpec((tile_rows, LANES), lambda i: (i, 0)),
            ],
            out_specs=pl.BlockSpec((1, LANES), lambda i: (0, 0)),
            scratch_shapes=[
                pltpu.VMEM((SUBLANES, LANES), jnp.float32),
                pltpu.VMEM((SUBLANES, LANES), jnp.float32),
            ],
        ),
        compiler_params=pltpu.CompilerParams(
            dimension_semantics=("arbitrary",),
        ),
    )(x, t)
    return out[0, 0]


def _iou_loss_ref(inputs, targets, smooth=1.0):
    x = jax.nn.sigmoid(inputs.astype(jnp.float32)).reshape(-1)
    t = targets.astype(jnp.float32).reshape(-1)
    inter = jnp.sum(x * t)
    total = jnp.sum(x + t)
    union = total - inter
    return 1.0 - (inter + smooth) / (union + smooth)


if __name__ == "__main__":
    key = jax.random.PRNGKey(0)
    k1, k2 = jax.random.split(key)

    # NCHW logits and binary targets, same shapes as the PyTorch module expects.
    inputs = jax.random.normal(k1, (2, 4, 16, 16), dtype=jnp.float32)
    targets = jax.random.bernoulli(k2, 0.5, (2, 4, 16, 16)).astype(jnp.float32)

    loss = jax.block_until_ready(iou_loss(inputs, targets, smooth=1.0))
    ref = jax.block_until_ready(_iou_loss_ref(inputs, targets, smooth=1.0))

    assert jnp.allclose(loss, ref, rtol=1e-5, atol=1e-5), (loss, ref)
    print("KERNEL_OK")
</pallas_src>

<mosaic_0001>
module attributes {stable_mosaic.version = 11 : i64} {
  func.func @_iou_kernel(%arg0: i32, %arg1: memref<16x128xf32, #tpu.memory_space<vmem>>, %arg2: memref<16x128xf32, #tpu.memory_space<vmem>>, %arg3: memref<1x128xf32, #tpu.memory_space<vmem>>, %arg4: memref<8x128xf32, #tpu.memory_space<vmem>>, %arg5: memref<8x128xf32, #tpu.memory_space<vmem>>) attributes {dimension_semantics = [#tpu.dimension_semantics<arbitrary>], iteration_bounds = array<i64: 1>, scalar_prefetch = 0 : i64, scratch_operands = 2 : i64, tpu.core_type = #tpu.core_type<tc>, window_params = [{transform_indices = @transform_0, window_bounds = array<i64: 16, 128>}, {transform_indices = @transform_1, window_bounds = array<i64: 16, 128>}, {pipeline_mode = #tpu.pipeline_mode<synchronous>, transform_indices = @transform_2, window_bounds = array<i64: 1, 128>}]} {
    %c0_i32 = arith.constant 0 : i32
    %0 = arith.cmpi eq, %arg0, %c0_i32 : i32
    %1 = arith.extui %0 : i1 to i32
    %c0_i32_0 = arith.constant 0 : i32
    %2 = arith.cmpi ne, %1, %c0_i32_0 : i32
    scf.if %2 {
      %cst_18 = arith.constant 0.000000e+00 : f32
      %39 = vector.broadcast %cst_18 : f32 to vector<8x128xf32>
      %c0_19 = arith.constant 0 : index
      %c0_20 = arith.constant 0 : index
      %40 = vector.load %arg4[%c0_19, %c0_20] : memref<8x128xf32, #tpu.memory_space<vmem>>, vector<8x128xf32>
      tpu.vector_store %arg4[%c0_19, %c0_20], %39 {strides = array<i32>} : memref<8x128xf32, #tpu.memory_space<vmem>>, vector<8x128xf32>,
      %cst_21 = arith.constant 0.000000e+00 : f32
      %41 = vector.broadcast %cst_21 : f32 to vector<8x128xf32>
      %c0_22 = arith.constant 0 : index
      %c0_23 = arith.constant 0 : index
      %42 = vector.load %arg5[%c0_22, %c0_23] : memref<8x128xf32, #tpu.memory_space<vmem>>, vector<8x128xf32>
      tpu.vector_store %arg5[%c0_22, %c0_23], %41 {strides = array<i32>} : memref<8x128xf32, #tpu.memory_space<vmem>>, vector<8x128xf32>,
    } else {
    }
    %c0 = arith.constant 0 : index
    %c0_1 = arith.constant 0 : index
    %3 = vector.load %arg1[%c0, %c0_1] : memref<16x128xf32, #tpu.memory_space<vmem>>, vector<16x128xf32>
    %c0_2 = arith.constant 0 : index
    %c0_3 = arith.constant 0 : index
    %4 = vector.load %arg2[%c0_2, %c0_3] : memref<16x128xf32, #tpu.memory_space<vmem>>, vector<16x128xf32>
    %5 = tpu.iota {dimensions = array<i32: 0>} : vector<16x128xi32>
    %6 = tpu.iota {dimensions = array<i32: 1>} : vector<16x128xi32>
    %c16_i32 = arith.constant 16 : i32
    %7 = arith.muli %arg0, %c16_i32 : i32
    %8 = vector.broadcast %7 : i32 to vector<16x128xi32>
    %9 = arith.addi %8, %5 : vector<16x128xi32>
    %c128_i32 = arith.constant 128 : i32
    %10 = vector.broadcast %c128_i32 : i32 to vector<16x128xi32>
    %11 = arith.muli %9, %10 : vector<16x128xi32>
    %12 = arith.addi %11, %6 : vector<16x128xi32>
    %c2048_i32 = arith.constant 2048 : i32
    %13 = vector.broadcast %c2048_i32 : i32 to vector<16x128xi32>
    %14 = arith.cmpi slt, %12, %13 : vector<16x128xi32>
    %15 = arith.negf %3 : vector<16x128xf32>
    %16 = math.exp %15 : vector<16x128xf32>
    %cst = arith.constant 1.000000e+00 : f32
    %17 = vector.broadcast %cst : f32 to vector<16x128xf32>
    %18 = arith.addf %17, %16 : vector<16x128xf32>
    %19 = arith.divf %17, %18 : vector<16x128xf32>
    %cst_4 = arith.constant 0.000000e+00 : f32
    %20 = vector.broadcast %cst_4 : f32 to vector<16x128xf32>
    %21 = arith.select %14, %19, %20 : vector<16x128xi1>, vector<16x128xf32>
    %cst_5 = arith.constant 0.000000e+00 : f32
    %22 = vector.broadcast %cst_5 : f32 to vector<16x128xf32>
    %23 = arith.select %14, %4, %22 : vector<16x128xi1>, vector<16x128xf32>
    %c0_6 = arith.constant 0 : index
    %c0_7 = arith.constant 0 : index
    %24 = vector.load %arg4[%c0_6, %c0_7] : memref<8x128xf32, #tpu.memory_space<vmem>>, vector<8x128xf32>
    %25 = arith.mulf %21, %23 : vector<16x128xf32>
    %26 = vector.shape_cast %25 : vector<16x128xf32> to vector<2x8x128xf32>
    %cst_8 = arith.constant dense<0.000000e+00> : vector<8x128xf32>
    %27 = vector.multi_reduction <add>, %26, %cst_8 [0] : vector<2x8x128xf32> to vector<8x128xf32>
    %28 = arith.addf %24, %27 : vector<8x128xf32>
    %c0_9 = arith.constant 0 : index
    %c0_10 = arith.constant 0 : index
    %29 = vector.load %arg4[%c0_9, %c0_10] : memref<8x128xf32, #tpu.memory_space<vmem>>, vector<8x128xf32>
    tpu.vector_store %arg4[%c0_9, %c0_10], %28 {strides = array<i32>} : memref<8x128xf32, #tpu.memory_space<vmem>>, vector<8x128xf32>,
    %c0_11 = arith.constant 0 : index
    %c0_12 = arith.constant 0 : index
    %30 = vector.load %arg5[%c0_11, %c0_12] : memref<8x128xf32, #tpu.memory_space<vmem>>, vector<8x128xf32>
    %31 = arith.addf %21, %23 : vector<16x128xf32>
    %32 = vector.shape_cast %31 : vector<16x128xf32> to vector<2x8x128xf32>
    %cst_13 = arith.constant dense<0.000000e+00> : vector<8x128xf32>
    %33 = vector.multi_reduction <add>, %32, %cst_13 [0] : vector<2x8x128xf32> to vector<8x128xf32>
    %34 = arith.addf %30, %33 : vector<8x128xf32>
    %c0_14 = arith.constant 0 : index
    %c0_15 = arith.constant 0 : index
    %35 = vector.load %arg5[%c0_14, %c0_15] : memref<8x128xf32, #tpu.memory_space<vmem>>, vector<8x128xf32>
    tpu.vector_store %arg5[%c0_14, %c0_15], %34 {strides = array<i32>} : memref<8x128xf32, #tpu.memory_space<vmem>>, vector<8x128xf32>,
    %c0_i32_16 = arith.constant 0 : i32
    %36 = arith.cmpi eq, %arg0, %c0_i32_16 : i32
    %37 = arith.extui %36 : i1 to i32
    %c0_i32_17 = arith.constant 0 : i32
    %38 = arith.cmpi ne, %37, %c0_i32_17 : i32
    scf.if %38 {
      %c0_18 = arith.constant 0 : index
      %c0_19 = arith.constant 0 : index
      %39 = vector.load %arg4[%c0_18, %c0_19] : memref<8x128xf32, #tpu.memory_space<vmem>>, vector<8x128xf32>
      %40 = vector.shape_cast %39 : vector<8x128xf32> to vector<1x8x128xf32>
      %cst_20 = arith.constant dense<0.000000e+00> : vector<1xf32>
      %41 = vector.multi_reduction <add>, %40, %cst_20 [1, 2] : vector<1x8x128xf32> to vector<1xf32>
      %42 = vector.shape_cast %41 : vector<1xf32> to vector<1x1x1xf32>
      %43 = vector.extract %42[0, 0, 0] : f32 from vector<1x1x1xf32>
      %c0_21 = arith.constant 0 : index
      %c0_22 = arith.constant 0 : index
      %44 = vector.load %arg5[%c0_21, %c0_22] : memref<8x128xf32, #tpu.memory_space<vmem>>, vector<8x128xf32>
      %45 = vector.shape_cast %44 : vector<8x128xf32> to vector<1x8x128xf32>
      %cst_23 = arith.constant dense<0.000000e+00> : vector<1xf32>
      %46 = vector.multi_reduction <add>, %45, %cst_23 [1, 2] : vector<1x8x128xf32> to vector<1xf32>
      %47 = vector.shape_cast %46 : vector<1xf32> to vector<1x1x1xf32>
      %48 = vector.extract %47[0, 0, 0] : f32 from vector<1x1x1xf32>
      %49 = arith.subf %48, %43 : f32
      %cst_24 = arith.constant 1.000000e+00 : f32
      %50 = arith.addf %43, %cst_24 : f32
      %cst_25 = arith.constant 1.000000e+00 : f32
      %51 = arith.addf %49, %cst_25 : f32
      %52 = arith.divf %50, %51 : f32
      %cst_26 = arith.constant 1.000000e+00 : f32
      %53 = arith.subf %cst_26, %52 : f32
      %54 = vector.broadcast %53 : f32 to vector<1x128xf32>
      %c0_27 = arith.constant 0 : index
      %c0_28 = arith.constant 0 : index
      %55 = vector.load %arg3[%c0_27, %c0_28] : memref<1x128xf32, #tpu.memory_space<vmem>>, vector<1x128xf32>
      tpu.vector_store %arg3[%c0_27, %c0_28], %54 {strides = array<i32>} : memref<1x128xf32, #tpu.memory_space<vmem>>, vector<1x128xf32>,
    } else {
    }
    return
  }
  func.func @transform_0(%arg0: i32) -> (i32, i32) {
    %c0_i32 = arith.constant 0 : i32
    %c0_i32_0 = arith.constant 0 : i32
    return %arg0, %c0_i32 : i32, i32
  }
  func.func @transform_1(%arg0: i32) -> (i32, i32) {
    %c0_i32 = arith.constant 0 : i32
    %c0_i32_0 = arith.constant 0 : i32
    return %arg0, %c0_i32 : i32, i32
  }
  func.func @transform_2(%arg0: i32) -> (i32, i32) {
    %c0_i32 = arith.constant 0 : i32
    %c0_i32_0 = arith.constant 0 : i32
    %c0_i32_1 = arith.constant 0 : i32
    return %c0_i32, %c0_i32_0 : i32, i32
  }
}

</mosaic_0001>

<bundles_post_ra>
// kernel: tpu_custom_call.1
= control target key start
LH: loop header
LB: loop body
LE: loop exit
PB: predicated region body
PF: predicated region fallthrough
CT: control target
= control target key end

     0   :  { %7 = vsyncpa [#allocation5], 0  ;;  %s319_s0 = inlined_call_operand.hbm [shape: f32[16,128], index: 0, kind: input, shape index: {}]   ;;  %s320_s1 = inlined_call_operand.hbm [shape: f32[16,128], index: 1, kind: input, shape index: {}]   ;;  %s321_s2 = inlined_call_operand.hbm [shape: f32[1,128], index: 2, kind: output, shape index: {}]  }
   0x1   :  { %8 = vsyncpa [#allocation8], 0 }
   0x2   :  { %9 = vsyncpa [#allocation6], 0  ;;  %s14_s11 = sshll.u32 %s319_s0, 4  ;;  %s288_s12 = smov [#allocation4]   ;;  %s15_s11 = int_to_ptr.hbm [resolvable:$true] %s14_s11 }
   0x3   :  { %s16_s13 = sshll.u32 %s288_s12, 4  ;;  %s27_s16 = sshll.u32 %s320_s1, 4  ;;  %s17_s13 = int_to_ptr.vmem [resolvable:$true] %s16_s13  ;;  %s28_s16 = int_to_ptr.hbm [resolvable:$true] %s27_s16 }
   0x4   :  { %s289_s17 = smov 128   ;;  %s290_s18 = smov 8  }
   0x5   :  { %22 = dma.hbm_to_vmem [thread:$0]  %s15_s11, 256, %s17_s13, [#allocation5], %s289_s17, %s289_s17, %s290_s18  }
   0x6   :  { %s291_s19 = smov [#allocation7]  }
   0x7   :  { %s29_s20 = sshll.u32 %s291_s19, 4  ;;  %s30_s20 = int_to_ptr.vmem [resolvable:$true] %s29_s20 }
   0x8   :  { %35 = dma.hbm_to_vmem [thread:$0]  %s28_s16, 256, %s30_s20, [#allocation8], %s289_s17, %s289_s17, %s290_s18  }
   0x9   :  { %282 = dma.done.wait [#allocation5], 256  }
   0xa   :  { %283 = vsyncadd [#allocation5], 4294967040 }
   0xb   :  { %284 = dma.done.wait [#allocation8], 256  }
   0xc   :  { %285 = vsyncadd [#allocation8], 4294967040  ;;  %v50_v0 = vld [vmem:[#allocation4] sm:$0xff]  ;;  %v51_v1 = vld [vmem:[#allocation4 + $0x8] sm:$0xff]  ;;  %v54_v4 = vlaneseq  ;;  %s292_s25 = smov [#allocation9]   ;;  %s176_s30 = sshll.u32 %s321_s2, 4  ;;  %s177_s30 = int_to_ptr.hbm [resolvable:$true] %s176_s30 }
   0xd   :  { %v187_v2 = vmul.f32 -1.442695, %v50_v0  ;;  %v188_v3 = vmul.f32 -1.442695, %v51_v1  ;;  %v52_v27 = vld [vmem:[#allocation7] sm:$0xff]  ;;  %v53_v30 = vld [vmem:[#allocation7 + $0x8] sm:$0xff] }
   0xe   :  { %v55_v5 = vshrl.u32 %v54_v4, 7  ;;  %v58_v11 = vand.u32 127, %v54_v4  ;;  %s174_s26 = sshll.u32 %s292_s25, 4  ;;  %s175_s26 = int_to_ptr.vmem [resolvable:$true] %s174_s26 }
   0xf   :  { %200 = vpow2.f32 %v187_v2 }
  0x10   :  { %202 = vpow2.f32 %v188_v3  ;;  %v56_v10 = vadd.s32 8, %v55_v5  ;;  %v63_v12 = vmul.u32 128, %v55_v5 }
  0x12   :  { %v64_v13 = vmul.u32 128, %v56_v10  ;;  %v65_v16 = vadd.s32 %v63_v12, %v58_v11 }
  0x14   :  { %v66_v18 = vadd.s32 %v64_v13, %v58_v11  ;;  %vm67_vm4 = vcmp.lt.s32.totalorder %v65_v16, 2048 }
  0x15   :  { %v201_v6 = vpop.eup %200  ;;  %v109_v35 = vsel %vm67_vm4, %v52_v27, 0.0 }
  0x16   :  { %v203_v7 = vpop.eup %202  ;;  %v75_v8 = vadd.f32 1.0, %v201_v6  ;;  %vm68_vm6 = vcmp.lt.s32.totalorder %v66_v18, 2048 }
  0x17   :  { %v76_v9 = vadd.f32 1.0, %v203_v7  ;;  %v110_v38 = vsel %vm68_vm6, %v53_v30, 0.0 }
  0x18   :  { %204 = vrcp.f32 %v75_v8  ;;  %vm82_vm0 = vweird.f32 %v75_v8  ;;  %v88_v19 = vand.u32 2147483648, %v75_v8  ;;  %v86_v22 = vand.u32 2147483647, %v75_v8 }
  0x19   :  { %206 = vrcp.f32 %v76_v9  ;;  %v103_v23 = vand.u32 2147483648, %v76_v9  ;;  %vm97_vm2 = vweird.f32 %v76_v9  ;;  %v101_v25 = vand.u32 2147483647, %v76_v9 }
  0x1a   :  { %v89_v28 = vor.u32 1.1754944e-38, %v88_v19  ;;  %vm87_vm7 = vcmp.eq.f32.partialorder %v86_v22, 8.507059e+37 }
  0x1b   :  { %v104_v32 = vor.u32 1.1754944e-38, %v103_v23  ;;  %vm102_vm9 = vcmp.eq.f32.partialorder %v101_v25, 8.507059e+37 }
  0x1e   :  { %v205_v14 = vpop.eup %204 }
  0x1f   :  { %v207_v15 = vpop.eup %206  ;;  %v78_v17 = vmul.f32 %v205_v14, %v75_v8  ;;  %vm83_vm1 = vweird.f32 %v205_v14 }
  0x20   :  { %v93_v20 = vmul.f32 %v207_v15, %v76_v9  ;;  %vm98_vm3 = vweird.f32 %v207_v15  ;;  %vm84_vm5 = vmor %vm82_vm0, %vm83_vm1 }
  0x21   :  { %v79_v21 = vsub.f32 1.0, %v78_v17  ;;  %vm99_vm8 = vmor %vm97_vm2, %vm98_vm3 }
  0x22   :  { %v94_v24 = vsub.f32 1.0, %v93_v20 }
  0x23   :  { %v80_v26 = vmul.f32 %v205_v14, %v79_v21 }
  0x24   :  { %v95_v29 = vmul.f32 %v207_v15, %v94_v24 }
  0x25   :  { %v81_v31 = vadd.f32 %v205_v14, %v80_v26 }
  0x26   :  { %v96_v33 = vadd.f32 %v207_v15, %v95_v29 }
  0x27   :  { %v85_v34 = vsel %vm84_vm5, %v205_v14, %v81_v31 }
  0x28   :  { %v90_v36 = vsel %vm87_vm7, %v89_v28, %v85_v34  ;;  %v100_v37 = vsel %vm99_vm8, %v207_v15, %v96_v33 }
  0x29   :  { %v105_v39 = vsel %vm102_vm9, %v104_v32, %v100_v37  ;;  %v107_v40 = vsel %vm67_vm4, %v90_v36, 0.0 }
  0x2a   :  { %v108_v41 = vsel %vm68_vm6, %v105_v39, 0.0  ;;  %v112_v42 = vmul.f32 %v109_v35, %v107_v40  ;;  %v118_v45 = vadd.f32 %v109_v35, %v107_v40 }
  0x2b   :  { %v113_v43 = vmul.f32 %v110_v38, %v108_v41  ;;  %v119_v46 = vadd.f32 %v110_v38, %v108_v41 }
  0x2d   :  { %v114_v44 = vadd.f32 %v113_v43, %v112_v42  ;;  %v120_v47 = vadd.f32 %v119_v46, %v118_v45 }
  0x2f   :  { %127 = vadd.xlane.f32.xlu0 %v114_v44 }
  0x37   :  { %137 = vadd.xlane.f32.xlu0 %v120_v47 }
  0xa2   :  { %v128_v48 = vpop.xlane.xlu0 %127 }
  0xa3   :  { %v129_v49 = vrot.slane %v128_v48, 4 }
  0xa5   :  { %v130_v50 = vadd.f32 %v129_v49, %v128_v48 }
  0xa7   :  { %v131_v51 = vrot.slane %v130_v50, 2 }
  0xa9   :  { %v132_v52 = vadd.f32 %v131_v51, %v130_v50 }
  0xaa   :  { %v138_v53 = vpop.xlane.xlu0 %137 }
  0xab   :  { %v139_v54 = vrot.slane %v138_v53, 4  ;;  %v133_v55 = vrot.slane %v132_v52, 1 }
  0xad   :  { %v140_v56 = vadd.f32 %v139_v54, %v138_v53  ;;  %v134_v57 = vadd.f32 %v133_v55, %v132_v52 }
  0xaf   :  { %v141_v58 = vrot.slane %v140_v56, 2  ;;  %189 = vpush %v134_v57 }
  0xb1   :  { %v142_v59 = vadd.f32 %v141_v58, %v140_v56 }
  0xb3   :  { %v143_v60 = vrot.slane %v142_v59, 1 }
  0xb5   :  { %v144_v61 = vadd.f32 %v143_v60, %v142_v59 }
  0xb7   :  { %191 = vpush %v144_v61 }
  0xe0   :  { %s190_s0 = spop %189 }
  0xe1   :  { %s147_s23 = sadd.f32 1.0, %s190_s0 }
  0xe8   :  { %s192_s1 = spop %191 }
  0xe9   :  { %s146_s21 = ssub.f32 %s192_s1, %s190_s0 }
  0xeb   :  { %s148_s22 = sadd.f32 1.0, %s146_s21 }
  0xed   :  { %v149_v62 = vstv %s148_s22 }
  0xee   :  { %208 = vrcp.f32 %v149_v62  ;;  %v161_v2 = vand.u32 2147483648, %v149_v62  ;;  %v159_v4 = vand.u32 2147483647, %v149_v62  ;;  %vm155_vm11 = vweird.f32 %v149_v62 }
  0xf0   :  { %v162_v6 = vor.u32 1.1754944e-38, %v161_v2  ;;  %vm160_vm13 = vcmp.eq.f32.partialorder %v159_v4, 8.507059e+37 }
  0xf4   :  { %v209_v63 = vpop.eup %208 }
  0xf5   :  { %v151_v0 = vmul.f32 %v209_v63, %v149_v62  ;;  %vm156_vm10 = vweird.f32 %v209_v63 }
  0xf6   :  { %vm157_vm12 = vmor %vm155_vm11, %vm156_vm10 }
  0xf7   :  { %v152_v1 = vsub.f32 1.0, %v151_v0 }
  0xf9   :  { %v153_v3 = vmul.f32 %v209_v63, %v152_v1 }
  0xfb   :  { %v154_v5 = vadd.f32 %v209_v63, %v153_v3 }
  0xfd   :  { %v158_v7 = vsel %vm157_vm12, %v209_v63, %v154_v5 }
  0xfe   :  { %v163_v8 = vsel %vm160_vm13, %v162_v6, %v158_v7 }
  0xff   :  { %193 = vpush %v163_v8 }
 0x130   :  { %s194_s24 = spop %193 }
 0x131   :  { %s165_s27 = smul.f32 %s194_s24, %s147_s23 }
 0x133   :  { %s166_s3 = ssub.f32 1.0, %s165_s27 }
 0x135   :  { %v167_v9 = vstv %s166_s3 }
 0x136   :  { %168 = vst [vmem:[#allocation9] sm:$0x1] %v167_v9 }
 0x137   :  { %179 = dma.vmem_to_hbm [thread:$0]  %s175_s26, 16, %s177_s30, [#allocation6]  }
 0x138   :  { %286 = dma.done.wait [#allocation6], 16  }
 0x139   :  { %287 = vsyncadd [#allocation6], 4294967280 }
 0x13a   :  { %184 = vsyncpa [#allocation5], 1 }
 0x13b   :  { %185 = vsyncpa [#allocation8], 1 }
 0x13c   :  { %186 = vsyncpa [#allocation6], 1 }

</bundles_post_ra>
